<compile_context>
chip_gen: v5e
topology: v5e:2x2
jax: 0.10.0
libtpu: 0.0.40
codegen_flags: <defaults>
</compile_context>

<pallas_src>
import functools

import jax
import jax.numpy as jnp
from jax.experimental import pallas as pl
from jax.experimental.pallas import tpu as pltpu


def _round_up(x, m):
    return (x + m - 1) // m * m


def _layer_norm_over_channels(x, eps=1e-5):
    # F.layer_norm(x.transpose(1,2), (d_model,)).transpose(1,2), channels on axis 0.
    # No affine params (F.layer_norm is called without weight/bias in the module).
    mu = jnp.mean(x, axis=0, keepdims=True)
    var = jnp.mean(jnp.square(x - mu), axis=0, keepdims=True)
    return (x - mu) * jax.lax.rsqrt(var + eps)


def _pick_chunk(d_inner, max_chunk):
    if d_inner <= max_chunk:
        return d_inner
    for c in (max_chunk, 1024, 512, 256, 128):
        if c <= max_chunk and d_inner % c == 0:
            return c
    return d_inner


def _ff_kernel(*refs, pre_lnorm, has_masks, chunk, n_chunks, matmul_dtype,
               precision):
    if has_masks:
        x_ref, w1_ref, b1_ref, w2_ref, b2_ref, k1_ref, k2_ref, out_ref = refs
    else:
        x_ref, w1_ref, b1_ref, w2_ref, b2_ref, out_ref = refs
        k1_ref = k2_ref = None

    # x_ref: (d_model, tile_l) -- channels on sublanes, positions on lanes.
    x = x_ref[...].astype(jnp.float32)
    if pre_lnorm:
        # Residual below uses this normalized x (PyTorch rebinds `inp`).
        x = _layer_norm_over_channels(x)
    x_mm = x.astype(matmul_dtype)

    # d_inner (K) chunked so MXU work of adjacent chunks overlaps the
    # elementwise relu/mask phase and h scratch stays (chunk, tile_l).
    y = None
    for c in range(n_chunks):
        lo = c * chunk
        hi = lo + chunk
        # ff1 chunk: Conv1d(k=1) == W1_c @ x.  f32 MXU accumulation.
        h = jnp.dot(w1_ref[lo:hi, :], x_mm,
                    preferred_element_type=jnp.float32, precision=precision)
        # Bias / relu / dropout-mask in the matmul dtype (scale already folded
        # into w1/b1 in the wrapper).
        h = h.astype(matmul_dtype) + b1_ref[lo:hi, :]
        h = jnp.maximum(h, 0.0)
        if has_masks:
            h = jnp.where(k1_ref[lo:hi, :] != 0, h, 0.0)
        # ff2 chunk: accumulate W2_c @ h_c in f32.
        yc = jnp.dot(w2_ref[:, lo:hi], h.astype(matmul_dtype),
                     preferred_element_type=jnp.float32, precision=precision)
        y = yc if y is None else y + yc

    y = y + b2_ref[...].astype(jnp.float32)
    if has_masks:
        y = jnp.where(k2_ref[...] != 0, y, 0.0)   # drop2 (scale folded)
    y = y + x                                     # residual
    if not pre_lnorm:
        y = _layer_norm_over_channels(y)
    out_ref[...] = y.astype(out_ref.dtype)


def weight_share_positionwise_ff(inp, w1, b1, w2, b2, keep1=None, keep2=None,
                                 dropout=0.0, *, pre_lnorm=False, tile_l=None,
                                 matmul_dtype=jnp.bfloat16, inner_chunk=1024):
    """Forward pass of WeightSharePositionwiseFF.

    inp:   (bsz, d_model, qlen)  NCW (PyTorch layout; stays NCW end-to-end)
    w1:    (d_inner, d_model, 1) Conv1d weight;  b1: (d_inner,)
    w2:    (d_model, d_inner, 1) Conv1d weight;  b2: (d_model,)
    keep1: (bsz, d_inner, qlen)  0/1 VariationalHidDropout keep-mask, or None
    keep2: (bsz, d_model, qlen)  0/1 VariationalHidDropout keep-mask, or None
    dropout: dropout prob p; the 1/(1-p) scale is folded into the weights.
    Pass keep1=keep2=None for the inference fast path (no dropout applied).
    Returns (bsz, d_model, qlen), dtype of inp.
    """
    bsz, d_model, qlen = inp.shape
    d_inner = w1.shape[0]
    has_masks = (keep1 is not None) and (keep2 is not None)

    in_item = jnp.dtype(inp.dtype).itemsize
    mm_item = jnp.dtype(matmul_dtype).itemsize
    exact_f32 = jnp.dtype(matmul_dtype) == jnp.dtype(jnp.float32)
    precision = jax.lax.Precision.HIGHEST if exact_f32 else None

    # Fold the dropout scale into the weights/biases once (relu commutes with a
    # positive scale), then the in-kernel mask is a plain select.
    scale = 1.0 / (1.0 - dropout) if (has_masks and dropout > 0.0) else 1.0
    w1_mat = (w1[:, :, 0].astype(jnp.float32) * scale).astype(matmul_dtype)
    b1_col = (b1.astype(jnp.float32) * scale).reshape(d_inner, 1).astype(matmul_dtype)
    w2_mat = (w2[:, :, 0].astype(jnp.float32) * scale).astype(matmul_dtype)
    b2_col = (b2.astype(jnp.float32) * scale).reshape(d_model, 1).astype(matmul_dtype)

    chunk = _pick_chunk(d_inner, inner_chunk)
    n_chunks = d_inner // chunk

    # Generation-aware VMEM budget (v5e/v6e: 128 MiB, v7x: 64 MiB per core).
    try:  # hardware query only; failure just means a conservative default.
        vmem_cap = int(getattr(pltpu.get_tpu_info(), "vmem_capacity_bytes",
                               64 << 20))
    except Exception:
        vmem_cap = 64 << 20
    vmem_limit = max(32 << 20,
                     min(int(vmem_cap * 0.85), vmem_cap - (4 << 20), 112 << 20))

    def _footprint(tl):
        w_b = 2 * 2 * d_model * d_inner * mm_item              # w1+w2, 2 buffers
        b_b = 2 * (d_inner + d_model) * 128 * mm_item          # lane-padded bias cols
        x_b = 2 * d_model * tl * in_item                       # x block, 2 buffers
        o_b = 2 * d_model * tl * in_item                       # out block, 2 buffers
        m_b = 2 * (d_inner + d_model) * tl if has_masks else 0  # int8 masks
        c_b = 2 * d_model * tl * 4 + chunk * tl * (4 + mm_item)  # f32 x/y + h chunk
        return w_b + b_b + x_b + o_b + m_b + int(1.5 * c_b)

    if tile_l is None:
        budget = int(vmem_limit * 0.9)
        if qlen <= 256:
            tile_l = qlen                      # full (small) seq axis in one block
        else:
            tile_l = 128
            for cand in (1024, 512, 256):      # largest lane-dense tile that fits
                if cand < qlen and _footprint(cand) <= budget:
                    tile_l = cand
                    break
        # Guarantee >= 2 grid steps where possible (v7x dual-TC + DMA overlap).
        if bsz * pl.cdiv(qlen, tile_l) < 2 and qlen > 128:
            tile_l = max(128, _round_up(pl.cdiv(qlen, 2), 128))
    n_l_blocks = pl.cdiv(qlen, tile_l)

    in_specs = [
        pl.BlockSpec((None, d_model, tile_l), lambda b, l: (b, 0, l)),   # x
        pl.BlockSpec((d_inner, d_model), lambda b, l: (0, 0)),           # w1
        pl.BlockSpec((d_inner, 1), lambda b, l: (0, 0)),                 # b1
        pl.BlockSpec((d_model, d_inner), lambda b, l: (0, 0)),           # w2
        pl.BlockSpec((d_model, 1), lambda b, l: (0, 0)),                 # b2
    ]
    args = [inp, w1_mat, b1_col, w2_mat, b2_col]
    if has_masks:
        in_specs += [
            pl.BlockSpec((None, d_inner, tile_l), lambda b, l: (b, 0, l)),  # keep1
            pl.BlockSpec((None, d_model, tile_l), lambda b, l: (b, 0, l)),  # keep2
        ]
        # int8 keep-masks: 4x less HBM read than f32.
        args += [keep1.astype(jnp.int8), keep2.astype(jnp.int8)]
    out_spec = pl.BlockSpec((None, d_model, tile_l), lambda b, l: (b, 0, l))

    flops = int(4 * bsz * qlen * d_model * d_inner)             # two matmuls
    transcendentals = int(bsz * qlen)                           # one rsqrt / position
    bytes_accessed = int(
        2 * bsz * d_model * qlen * in_item                      # x read + out write
        + 2 * d_model * d_inner * mm_item                       # weights
        + (d_model + d_inner) * mm_item                         # biases
        + (bsz * (d_inner + d_model) * qlen if has_masks else 0))  # int8 masks

    kernel = functools.partial(
        _ff_kernel, pre_lnorm=pre_lnorm, has_masks=has_masks,
        chunk=chunk, n_chunks=n_chunks, matmul_dtype=matmul_dtype,
        precision=precision)

    return pl.pallas_call(
        kernel,
        out_shape=jax.ShapeDtypeStruct((bsz, d_model, qlen), inp.dtype),
        grid_spec=pltpu.PrefetchScalarGridSpec(
            num_scalar_prefetch=0,
            grid=(bsz, n_l_blocks),
            in_specs=in_specs,
            out_specs=out_spec,
        ),
        compiler_params=pltpu.CompilerParams(
            dimension_semantics=("parallel", "parallel"),
            vmem_limit_bytes=int(vmem_limit)),
        cost_estimate=pl.CostEstimate(
            flops=flops, transcendentals=transcendentals,
            bytes_accessed=bytes_accessed),
    )(*args)


# ---------------------------------------------------------------------------
# Pure-JAX reference of the PyTorch forward (for verification).
# ---------------------------------------------------------------------------
def _ln_ncw(x, eps=1e-5):
    mu = jnp.mean(x, axis=1, keepdims=True)
    var = jnp.mean((x - mu) ** 2, axis=1, keepdims=True)
    return (x - mu) * jax.lax.rsqrt(var + eps)


def _reference(inp, w1, b1, w2, b2, keep1, keep2, dropout, pre_lnorm):
    hp = jax.lax.Precision.HIGHEST
    scale = 1.0 / (1.0 - dropout) if dropout > 0.0 else 1.0
    m1 = keep1.astype(jnp.float32) * scale if keep1 is not None else 1.0
    m2 = keep2.astype(jnp.float32) * scale if keep2 is not None else 1.0
    x = inp
    if pre_lnorm:
        x = _ln_ncw(x)
    h = jnp.einsum('oc,bcl->bol', w1[:, :, 0], x, precision=hp) + b1[None, :, None]
    h = jnp.maximum(h, 0.0) * m1
    y = jnp.einsum('oc,bcl->bol', w2[:, :, 0], h, precision=hp) + b2[None, :, None]
    y = y * m2 + x
    if not pre_lnorm:
        y = _ln_ncw(y)
    return y


if __name__ == "__main__":
    key = jax.random.PRNGKey(0)
    (k_in, k_w1, k_b1, k_w2, k_b2, k_m1, k_m2,
     k_in2, k_m3, k_m4) = jax.random.split(key, 10)

    bsz, qlen = 2, 8
    d_model, d_inner = 32, 64
    dropout = 0.1

    inp = jax.random.normal(k_in, (bsz, d_model, qlen), dtype=jnp.float32)
    w1 = jax.random.normal(k_w1, (d_inner, d_model, 1), dtype=jnp.float32) * 0.05
    b1 = jax.random.normal(k_b1, (d_inner,), dtype=jnp.float32) * 0.05
    w2 = jax.random.normal(k_w2, (d_model, d_inner, 1), dtype=jnp.float32) * 0.05
    b2 = jax.random.normal(k_b2, (d_model,), dtype=jnp.float32) * 0.05
    # VariationalHidDropout keep-masks (fixed per reset_mask); 0/1.
    keep1 = jax.random.bernoulli(k_m1, 1.0 - dropout, (bsz, d_inner, qlen))
    keep2 = jax.random.bernoulli(k_m2, 1.0 - dropout, (bsz, d_model, qlen))

    ok = True
    for pre_lnorm in (False, True):
        ref = _reference(inp, w1, b1, w2, b2, keep1, keep2, dropout, pre_lnorm)
        # exact-precision path (f32 MXU operands, precision=HIGHEST)
        out_f32 = jax.block_until_ready(weight_share_positionwise_ff(
            inp, w1, b1, w2, b2, keep1, keep2, dropout,
            pre_lnorm=pre_lnorm, matmul_dtype=jnp.float32))
        ok &= bool(jnp.allclose(out_f32, ref, atol=1e-3, rtol=1e-3))
        # default perf path (bf16 MXU operands, f32 accumulation)
        out_bf = jax.block_until_ready(weight_share_positionwise_ff(
            inp, w1, b1, w2, b2, keep1, keep2, dropout, pre_lnorm=pre_lnorm))
        ok &= bool(jnp.allclose(out_bf, ref, atol=3e-2, rtol=3e-2))

    # Ragged qlen: partial last seq block handled by Pallas, no wrapper padding.
    qlen2 = 300
    inp2 = jax.random.normal(k_in2, (bsz, d_model, qlen2), dtype=jnp.float32)
    keep1b = jax.random.bernoulli(k_m3, 1.0 - dropout, (bsz, d_inner, qlen2))
    keep2b = jax.random.bernoulli(k_m4, 1.0 - dropout, (bsz, d_model, qlen2))
    ref2 = _reference(inp2, w1, b1, w2, b2, keep1b, keep2b, dropout, False)
    out2 = jax.block_until_ready(weight_share_positionwise_ff(
        inp2, w1, b1, w2, b2, keep1b, keep2b, dropout,
        pre_lnorm=False, tile_l=128, matmul_dtype=jnp.float32))
    ok &= bool(jnp.allclose(out2, ref2, atol=1e-3, rtol=1e-3))

    # Inference fast path: no masks streamed, no dropout applied.
    ref3 = _reference(inp2, w1, b1, w2, b2, None, None, 0.0, True)
    out3 = jax.block_until_ready(weight_share_positionwise_ff(
        inp2, w1, b1, w2, b2, None, None, 0.0,
        pre_lnorm=True, matmul_dtype=jnp.float32))
    ok &= bool(jnp.allclose(out3, ref3, atol=1e-3, rtol=1e-3))

    print("KERNEL_OK" if ok else "KERNEL_MISMATCH")
</pallas_src>

<mosaic_0001>
module attributes {stable_mosaic.version = 11 : i64} {
  func.func @_ff_kernel(%arg0: i32, %arg1: i32, %arg2: memref<1x32x8xf32, #tpu.memory_space<vmem>>, %arg3: memref<64x32xf32, #tpu.memory_space<vmem>>, %arg4: memref<64x1xf32, #tpu.memory_space<vmem>>, %arg5: memref<32x64xf32, #tpu.memory_space<vmem>>, %arg6: memref<32x1xf32, #tpu.memory_space<vmem>>, %arg7: memref<1x64x8xi8, #tpu.memory_space<vmem>>, %arg8: memref<1x32x8xi8, #tpu.memory_space<vmem>>, %arg9: memref<1x32x8xf32, #tpu.memory_space<vmem>>) attributes {dimension_semantics = [#tpu.dimension_semantics<parallel>, #tpu.dimension_semantics<parallel>], iteration_bounds = array<i64: 2, 1>, scalar_prefetch = 0 : i64, scratch_operands = 0 : i64, tpu.core_type = #tpu.core_type<tc>, window_params = [{transform_indices = @transform_0, window_bounds = array<i64: 1, 32, 8>}, {pipeline_mode = #tpu.pipeline_mode<synchronous>, transform_indices = @transform_1, window_bounds = array<i64: 64, 32>}, {pipeline_mode = #tpu.pipeline_mode<synchronous>, transform_indices = @transform_2, window_bounds = array<i64: 64, 1>}, {pipeline_mode = #tpu.pipeline_mode<synchronous>, transform_indices = @transform_3, window_bounds = array<i64: 32, 64>}, {pipeline_mode = #tpu.pipeline_mode<synchronous>, transform_indices = @transform_4, window_bounds = array<i64: 32, 1>}, {transform_indices = @transform_5, window_bounds = array<i64: 1, 64, 8>}, {transform_indices = @transform_6, window_bounds = array<i64: 1, 32, 8>}, {transform_indices = @transform_7, window_bounds = array<i64: 1, 32, 8>}]} {
    %c0 = arith.constant 0 : index
    %c0_0 = arith.constant 0 : index
    %c0_1 = arith.constant 0 : index
    %0 = vector.load %arg2[%c0, %c0_0, %c0_1] : memref<1x32x8xf32, #tpu.memory_space<vmem>>, vector<1x32x8xf32>
    %1 = vector.shape_cast %0 : vector<1x32x8xf32> to vector<32x8xf32>
    %c0_2 = arith.constant 0 : index
    %c0_3 = arith.constant 0 : index
    %2 = vector.load %arg3[%c0_2, %c0_3] : memref<64x32xf32, #tpu.memory_space<vmem>>, vector<64x32xf32>
    %cst = arith.constant dense<0.000000e+00> : vector<64x8xf32>
    %3 = tpu.matmul %2, %1, %cst {dimension_numbers = #tpu.dot_dimension_numbers<[1], [0], [0], [1], [0, 0, 1, 1], [], []>, precision = #tpu.contract_precision<fp32>} : vector<64x32xf32>, vector<32x8xf32>, vector<64x8xf32> -> vector<64x8xf32>
    %c0_4 = arith.constant 0 : index
    %c0_5 = arith.constant 0 : index
    %4 = vector.load %arg4[%c0_4, %c0_5] : memref<64x1xf32, #tpu.memory_space<vmem>>, vector<64x1xf32>
    %5 = vector.broadcast %4 : vector<64x1xf32> to vector<64x8xf32>
    %6 = arith.addf %3, %5 : vector<64x8xf32>
    %cst_6 = arith.constant 0.000000e+00 : f32
    %7 = vector.broadcast %cst_6 : f32 to vector<64x8xf32>
    %8 = arith.maximumf %6, %7 : vector<64x8xf32>
    %c0_7 = arith.constant 0 : index
    %c0_8 = arith.constant 0 : index
    %c0_9 = arith.constant 0 : index
    %9 = vector.load %arg7[%c0_7, %c0_8, %c0_9] : memref<1x64x8xi8, #tpu.memory_space<vmem>>, vector<1x64x8xi8>
    %10 = vector.shape_cast %9 : vector<1x64x8xi8> to vector<64x8xi8>
    %c0_i8 = arith.constant 0 : i8
    %11 = vector.broadcast %c0_i8 : i8 to vector<64x8xi8>
    %12 = arith.cmpi ne, %10, %11 : vector<64x8xi8>
    %cst_10 = arith.constant 0.000000e+00 : f32
    %13 = vector.broadcast %cst_10 : f32 to vector<64x8xf32>
    %14 = arith.select %12, %8, %13 : vector<64x8xi1>, vector<64x8xf32>
    %c0_11 = arith.constant 0 : index
    %c0_12 = arith.constant 0 : index
    %15 = vector.load %arg5[%c0_11, %c0_12] : memref<32x64xf32, #tpu.memory_space<vmem>>, vector<32x64xf32>
    %cst_13 = arith.constant dense<0.000000e+00> : vector<32x8xf32>
    %16 = tpu.matmul %15, %14, %cst_13 {dimension_numbers = #tpu.dot_dimension_numbers<[1], [0], [0], [1], [0, 0, 1, 1], [], []>, precision = #tpu.contract_precision<fp32>} : vector<32x64xf32>, vector<64x8xf32>, vector<32x8xf32> -> vector<32x8xf32>
    %c0_14 = arith.constant 0 : index
    %c0_15 = arith.constant 0 : index
    %17 = vector.load %arg6[%c0_14, %c0_15] : memref<32x1xf32, #tpu.memory_space<vmem>>, vector<32x1xf32>
    %18 = vector.broadcast %17 : vector<32x1xf32> to vector<32x8xf32>
    %19 = arith.addf %16, %18 : vector<32x8xf32>
    %c0_16 = arith.constant 0 : index
    %c0_17 = arith.constant 0 : index
    %c0_18 = arith.constant 0 : index
    %20 = vector.load %arg8[%c0_16, %c0_17, %c0_18] : memref<1x32x8xi8, #tpu.memory_space<vmem>>, vector<1x32x8xi8>
    %21 = vector.shape_cast %20 : vector<1x32x8xi8> to vector<32x8xi8>
    %c0_i8_19 = arith.constant 0 : i8
    %22 = vector.broadcast %c0_i8_19 : i8 to vector<32x8xi8>
    %23 = arith.cmpi ne, %21, %22 : vector<32x8xi8>
    %cst_20 = arith.constant 0.000000e+00 : f32
    %24 = vector.broadcast %cst_20 : f32 to vector<32x8xf32>
    %25 = arith.select %23, %19, %24 : vector<32x8xi1>, vector<32x8xf32>
    %26 = arith.addf %25, %1 : vector<32x8xf32>
    %cst_21 = arith.constant dense<0.000000e+00> : vector<8xf32>
    %27 = vector.multi_reduction <add>, %26, %cst_21 [0] : vector<32x8xf32> to vector<8xf32>
    %28 = vector.shape_cast %27 : vector<8xf32> to vector<1x8xf32>
    %cst_22 = arith.constant 3.200000e+01 : f32
    %29 = vector.broadcast %cst_22 : f32 to vector<1x8xf32>
    %30 = arith.divf %28, %29 : vector<1x8xf32>
    %31 = vector.broadcast %30 : vector<1x8xf32> to vector<32x8xf32>
    %32 = arith.subf %26, %31 : vector<32x8xf32>
    %33 = arith.mulf %32, %32 : vector<32x8xf32>
    %cst_23 = arith.constant dense<0.000000e+00> : vector<8xf32>
    %34 = vector.multi_reduction <add>, %33, %cst_23 [0] : vector<32x8xf32> to vector<8xf32>
    %35 = vector.shape_cast %34 : vector<8xf32> to vector<1x8xf32>
    %cst_24 = arith.constant 3.200000e+01 : f32
    %36 = vector.broadcast %cst_24 : f32 to vector<1x8xf32>
    %37 = arith.divf %35, %36 : vector<1x8xf32>
    %38 = vector.broadcast %30 : vector<1x8xf32> to vector<32x8xf32>
    %39 = arith.subf %26, %38 : vector<32x8xf32>
    %cst_25 = arith.constant 9.99999974E-6 : f32
    %40 = vector.broadcast %cst_25 : f32 to vector<1x8xf32>
    %41 = arith.addf %37, %40 : vector<1x8xf32>
    %42 = math.rsqrt %41 : vector<1x8xf32>
    %43 = vector.broadcast %42 : vector<1x8xf32> to vector<32x8xf32>
    %44 = arith.mulf %39, %43 : vector<32x8xf32>
    %c0_26 = arith.constant 0 : index
    %c0_27 = arith.constant 0 : index
    %c0_28 = arith.constant 0 : index
    %45 = vector.load %arg9[%c0_26, %c0_27, %c0_28] : memref<1x32x8xf32, #tpu.memory_space<vmem>>, vector<1x32x8xf32>
    %46 = vector.shape_cast %45 : vector<1x32x8xf32> to vector<32x8xf32>
    %47 = vector.shape_cast %44 : vector<32x8xf32> to vector<1x32x8xf32>
    tpu.vector_store %arg9[%c0_26, %c0_27, %c0_28], %47 {strides = array<i32>} : memref<1x32x8xf32, #tpu.memory_space<vmem>>, vector<1x32x8xf32>,
    return
  }
  func.func @transform_0(%arg0: i32, %arg1: i32) -> (i32, i32, i32) {
    %c0_i32 = arith.constant 0 : i32
    %c0_i32_0 = arith.constant 0 : i32
    return %arg0, %c0_i32, %arg1 : i32, i32, i32
  }
  func.func @transform_1(%arg0: i32, %arg1: i32) -> (i32, i32) {
    %c0_i32 = arith.constant 0 : i32
    %c0_i32_0 = arith.constant 0 : i32
    %c0_i32_1 = arith.constant 0 : i32
    return %c0_i32, %c0_i32_0 : i32, i32
  }
  func.func @transform_2(%arg0: i32, %arg1: i32) -> (i32, i32) {
    %c0_i32 = arith.constant 0 : i32
    %c0_i32_0 = arith.constant 0 : i32
    %c0_i32_1 = arith.constant 0 : i32
    return %c0_i32, %c0_i32_0 : i32, i32
  }
  func.func @transform_3(%arg0: i32, %arg1: i32) -> (i32, i32) {
    %c0_i32 = arith.constant 0 : i32
    %c0_i32_0 = arith.constant 0 : i32
    %c0_i32_1 = arith.constant 0 : i32
    return %c0_i32, %c0_i32_0 : i32, i32
  }
  func.func @transform_4(%arg0: i32, %arg1: i32) -> (i32, i32) {
    %c0_i32 = arith.constant 0 : i32
    %c0_i32_0 = arith.constant 0 : i32
    %c0_i32_1 = arith.constant 0 : i32
    return %c0_i32, %c0_i32_0 : i32, i32
  }
  func.func @transform_5(%arg0: i32, %arg1: i32) -> (i32, i32, i32) {
    %c0_i32 = arith.constant 0 : i32
    %c0_i32_0 = arith.constant 0 : i32
    return %arg0, %c0_i32, %arg1 : i32, i32, i32
  }
  func.func @transform_6(%arg0: i32, %arg1: i32) -> (i32, i32, i32) {
    %c0_i32 = arith.constant 0 : i32
    %c0_i32_0 = arith.constant 0 : i32
    return %arg0, %c0_i32, %arg1 : i32, i32, i32
  }
  func.func @transform_7(%arg0: i32, %arg1: i32) -> (i32, i32, i32) {
    %c0_i32 = arith.constant 0 : i32
    %c0_i32_0 = arith.constant 0 : i32
    return %arg0, %c0_i32, %arg1 : i32, i32, i32
  }
}

</mosaic_0001>

<bundles_post_ra>
// kernel: tpu_custom_call.1
= control target key start
LH: loop header
LB: loop body
LE: loop exit
PB: predicated region body
PF: predicated region fallthrough
CT: control target
= control target key end

     0   :  { %s1628_s24 = smov 0   ;;  %s1630_s25 = smov 0   ;;  %s2120_s0 = inlined_call_operand.vmem [shape: f32[2,32,8], index: 0, kind: input, shape index: {}]   ;;  %s2121_s1 = inlined_call_operand.vmem [shape: f32[64,32], index: 1, kind: input, shape index: {}]   ;;  %s2122_s2 = inlined_call_operand.vmem [shape: f32[64,1], index: 2, kind: input, shape index: {}]   ;;  %s2123_s3 = inlined_call_operand.vmem [shape: f32[32,64], index: 3, kind: input, shape index: {}]   ;;  %s2124_s4 = inlined_call_operand.vmem [shape: f32[32,1], index: 4, kind: input, shape index: {}]   ;;  %s2125_s5 = inlined_call_operand.vmem [shape: s8[2,64,8], index: 5, kind: input, shape index: {}]   ;;  %s2126_s6 = inlined_call_operand.vmem [shape: s8[2,32,8], index: 6, kind: input, shape index: {}]   ;;  %s2127_s7 = inlined_call_operand.vmem [shape: f32[2,32,8], index: 7, kind: output, shape index: {}]  }
   0x1   :  { %s1632_s26 = smov 0  }
   0x2 LB: > { %s29_s27 = sadd.s32 1, %s1580_s25  ;;  %p1502_p0 = scmp.ge.s32.totalorder %s1584_s26, 1  ;;  %s1584_s26 = sphi %s1632_s26, %s17_s26   ;;  %s1580_s25 = sphi %s1630_s25, %s2137_s25   ;;  %s1576_s24 = sphi %s1628_s24, %s2136_s24  }
   0x3   : > { %p31_p1 = scmp.ge.s32.totalorder %s29_s27, 2  ;;  %p286_p2 = scmp.lt.s32.totalorder %s1584_s26, 3 }
   0x5   : > { %s2139_s27 = smov (%p31_p1, %s29_s27), 0  ;;  %p287_p3 = pnand %p1502_p0, %p286_p2 }
   0x6   : > { %p340_p4 = scmp.lt.s32.totalorder (!%p287_p3), %s1576_s24, 1 }
   0x7   : > { %290 = sbr.rel (%p287_p3) target bundleno = 559 (0x22f), region = 48 }
   0xc   : > { %v378_v0 = vld [vmem:[%s2121_s1] sm:$0xff]  ;;  %vm434_vm0 = vcmask 261120   ;;  %v384_v1 = vld [vmem:[%s2121_s1 + $0x30] sm:$0xff]  ;;  %v391_v2 = vld [vmem:[%s2122_s2 + $0x28] sm:$0xff]  ;;  %v1586_v3 = vmov 0   ;;  %s2141_s24 = smov (!%p340_p4, %s1576_s24), 1 }
   0xd   : > { %1552 = vset.pattern.permute.xlu1 %v1586_v3  ;;  %v436_v4 = vsel %vm434_vm0, %v378_v0, 0  ;;  %v454_v5 = vsel %vm434_vm0, %v384_v1, 0  ;;  %1551 = vset.pattern.permute.xlu0 %v1586_v3  ;;  %v379_v6 = vld [vmem:[%s2121_s1 + $0x8] sm:$0xff]  ;;  %v385_v7 = vld [vmem:[%s2121_s1 + $0x38] sm:$0xff]  ;;  %v380_v14 = vld [vmem:[%s2121_s1 + $0x10] sm:$0xff]  ;;  %s1513_s19 = sshll.u32 %s2141_s24, 5 }
   0xe   : > { %v393_v8 = vld [vmem:[%s2122_s2 + $0x38] sm:$0xff]  ;;  %v1670_v9 = vand.u32 4294901760, %v436_v4  ;;  %v1672_v10 = vand.u32 4294901760, %v454_v5  ;;  %421 = vperm.xlu1 %1552, %v391_v2   ;;  %v439_v11 = vsel %vm434_vm0, %v379_v6, 0  ;;  %v457_v12 = vsel %vm434_vm0, %v385_v7, 0  ;;  %1553 = vset.pattern.permute.xlu2 %v1586_v3  ;;  %s1696_s22 = scalar_lea.vmem %s2120_s0, %s1513_s19  ;;  %v390_v29 = vld [vmem:[%s2122_s2 + $0x20] sm:$0xff] }
   0xf   : > { %431 = vperm.xlu0 %1551, %v393_v8   ;;  %v1676_v13 = vand.u32 4294901760, %v439_v11  ;;  %v1689_v17 = vand.u32 4294901760, %v457_v12  ;;  %v377_v18 = vld [vmem:[%s1696_s22 + $0x18] sm:$0xff]  ;;  %v376_v19 = vld [vmem:[%s1696_s22 + $0x10] sm:$0xff]  ;;  %v375_v20 = vld [vmem:[%s1696_s22 + $0x8] sm:$0xff]  ;;  %v442_v23 = vsel %vm434_vm0, %v380_v14, 0 }
  0x10   : > { %v1684_v15 = vsub.f32 %v436_v4, %v1670_v9  ;;  %v1687_v16 = vsub.f32 %v454_v5, %v1672_v10  ;;  %v1704_v24 = vand.u32 4294901760, %v377_v18  ;;  %v1706_v25 = vand.u32 4294901760, %v376_v19  ;;  %v374_v27 = vld [vmem:[%s1696_s22] sm:$0xff]  ;;  %v392_v30 = vld [vmem:[%s2122_s2 + $0x30] sm:$0xff]  ;;  %v381_v51 = vld [vmem:[%s2121_s1 + $0x18] sm:$0xff]  ;;  %s1514_s13 = sshll.u32 %s2141_s24, 4 }
  0x11   : > { %v1708_v26 = vand.u32 4294901760, %v375_v20  ;;  %v1712_v28 = vsub.f32 %v439_v11, %v1676_v13  ;;  %v1720_v31 = vand.u32 4294901760, %v374_v27  ;;  %v1729_v34 = vsub.f32 %v457_v12, %v1689_v17  ;;  %v386_v55 = vld [vmem:[%s2122_s2] sm:$0xff]  ;;  %v387_v61 = vld [vmem:[%s2122_s2 + $0x8] sm:$0xff]  ;;  %s1888_s16 = scalar_lea.vmem %s2125_s5, %s1514_s13  ;;  %s1515_s8 = sshll.u32 %s2141_s24, 3 }
  0x12   : > { %v481_v21 = vand.u32 4294901760, %v1684_v15  ;;  %v529_v22 = vand.u32 4294901760, %v1687_v16  ;;  %472 = vmatpush.msra.mxu0 %v1704_v24  ;;  %1517 = vmatpush.msra.mxu2 %v1704_v24  ;;  %v557_v35 = vsub.f32 %v377_v18, %v1704_v24  ;;  %v1735_v36 = vsub.f32 %v376_v19, %v1706_v25  ;;  %v382_v4 = vld [vmem:[%s2121_s1 + $0x20] sm:$0xff]  ;;  %v383_v14 = vld [vmem:[%s2121_s1 + $0x28] sm:$0xff]  ;;  %s363_s11 = scalar_lea.vmem %s2126_s6, %s1515_s8  ;;  %s371_s13 = scalar_lea.vmem %s2127_s7, %s1513_s19 }
  0x13   : > { %v1738_v37 = vsub.f32 %v375_v20, %v1708_v26  ;;  %v1741_v38 = vsub.f32 %v374_v27, %v1720_v31  ;;  %v1743_v39 = vand.u32 4294901760, %v442_v23  ;;  %v489_v43 = vand.u32 4294901760, %v1712_v28 }
  0x14   : > { %v482_v32 = vsub.f32 %v1684_v15, %v481_v21  ;;  %v530_v33 = vsub.f32 %v1687_v16, %v529_v22  ;;  %474 = vmatpush.msra.mxu0 %v1706_v25  ;;  %1518 = vmatpush.msra.mxu2 %v1706_v25  ;;  %v558_v40 = vand.u32 4294901760, %v557_v35  ;;  %v564_v41 = vand.u32 4294901760, %v1735_v36 }
  0x15   : > { %v570_v42 = vand.u32 4294901760, %v1738_v37  ;;  %v576_v46 = vand.u32 4294901760, %v1741_v38  ;;  %v537_v47 = vand.u32 4294901760, %v1729_v34  ;;  %v490_v56 = vsub.f32 %v1712_v28, %v489_v43 }
  0x16   : > { %416 = vperm.xlu1 %1552, %v390_v29   ;;  %v483_v44 = vand.u32 4294901760, %v482_v32  ;;  %v531_v45 = vand.u32 4294901760, %v530_v33  ;;  %476 = vmatpush.msra.mxu0 %v1708_v26  ;;  %v559_v48 = vsub.f32 %v557_v35, %v558_v40  ;;  %v565_v49 = vsub.f32 %v1735_v36, %v564_v41 }
  0x17   : > { %426 = vperm.xlu0 %1551, %v392_v30   ;;  %1519 = vmatpush.msra.mxu2 %v1708_v26  ;;  %v571_v50 = vsub.f32 %v1738_v37, %v570_v42  ;;  %v577_v54 = vsub.f32 %v1741_v38, %v576_v46  ;;  %v538_v57 = vsub.f32 %v1729_v34, %v537_v47  ;;  %v445_v60 = vsel %vm434_vm0, %v381_v51, 0  ;;  %v388_v30 = vld [vmem:[%s2122_s2 + $0x10] sm:$0xff] }
  0x18   : > { %478 = vmatpush.msra.mxu0 %v1720_v31  ;;  %v560_v52 = vand.u32 4294901760, %v559_v48  ;;  %v566_v53 = vand.u32 4294901760, %v565_v49  ;;  %v1772_v58 = vsub.f32 %v442_v23, %v1743_v39  ;;  %v491_v63 = vand.u32 4294901760, %v490_v56  ;;  %v389_v23 = vld [vmem:[%s2122_s2 + $0x18] sm:$0xff] }
  0x19   : > { %1520 = vmatpush.msra.mxu2 %v1720_v31  ;;  %484 = vmatmul.f32.vlgmr.msra.gmra.mxu0 %v483_v44  ;;  %v572_v59 = vand.u32 4294901760, %v571_v50  ;;  %v578_v62 = vand.u32 4294901760, %v577_v54  ;;  %v539_v0 = vand.u32 4294901760, %v538_v57  ;;  %v1780_v2 = vand.u32 4294901760, %v445_v60 }
  0x1a   : > { %532 = vmatmul.f32.vlgmr.msra.gmra.mxu2 %v531_v45  ;;  %561 = vmatpush.msra.mxu1 %v560_v52  ;;  %v497_v1 = vand.u32 4294901760, %v1772_v58  ;;  %v448_v7 = vsel %vm434_vm0, %v382_v4, 0  ;;  %v451_v20 = vsel %vm434_vm0, %v383_v14, 0  ;;  %vm945_vm12 = vcmask 523264  }
  0x1b   : > { %1521 = vmatpush.msra.mxu3 %v560_v52  ;;  %627 = vmatpush.msrb.mxu2 %v557_v35  ;;  %v504_v6 = vsub.f32 %v445_v60, %v1780_v2  ;;  %v1797_v12 = vand.u32 4294901760, %v448_v7 }
  0x1c   : > { %567 = vmatpush.msra.mxu1 %v566_v53  ;;  %762 = vmatpush.msrb.mxu0 %v558_v40  ;;  %v498_v5 = vsub.f32 %v1772_v58, %v497_v1 }
  0x1d   : > { %1522 = vmatpush.msra.mxu3 %v566_v53  ;;  %630 = vmatpush.msrb.mxu2 %v1735_v36  ;;  %v505_v11 = vand.u32 4294901760, %v504_v6  ;;  %v512_v19 = vsub.f32 %v448_v7, %v1797_v12 }
  0x1e   : > { %396 = vperm.xlu1 %1552, %v386_v55   ;;  %573 = vmatpush.msra.mxu1 %v572_v59  ;;  %v499_v8 = vand.u32 4294901760, %v498_v5 }
  0x1f   : > { %401 = vperm.xlu0 %1551, %v387_v61   ;;  %1523 = vmatpush.msra.mxu3 %v572_v59  ;;  %v506_v18 = vsub.f32 %v504_v6, %v505_v11 }
  0x20   : > { %633 = vmatpush.msrb.mxu2 %v1738_v37  ;;  %579 = vmatpush.msra.mxu1 %v578_v62 }
  0x21   : > { %1524 = vmatpush.msra.mxu3 %v578_v62  ;;  %492 = vmatmul.f32.gmra.mxu0 %v491_v63 }
  0x22   : > { %540 = vmatmul.f32.gmra.mxu2 %v539_v0  ;;  %581 = vmatmul.f32.vlgmr.msra.gmra.mxu1 %v1670_v9 }
  0x23   : > { %605 = vmatmul.f32.vlgmr.msra.gmra.mxu3 %v1672_v10  ;;  %636 = vmatpush.msrb.mxu2 %v1741_v38 }
  0x24   : > { %691 = vmatpush.msrb.mxu3 %v1704_v24  ;;  %766 = vmatpush.msrb.mxu0 %v564_v41 }
  0x25   : > { %821 = vmatpush.msrb.mxu1 %v1704_v24  ;;  %411 = vperm.xlu2 %1553, %v389_v23   ;;  %v507_v24 = vand.u32 4294901760, %v506_v18 }
  0x26   : > { %693 = vmatpush.msrb.mxu3 %v1706_v25  ;;  %770 = vmatpush.msrb.mxu0 %v570_v42 }
  0x27   : > { %823 = vmatpush.msrb.mxu1 %v1706_v25  ;;  %v513_v25 = vand.u32 4294901760, %v512_v19 }
  0x28   : > { %695 = vmatpush.msrb.mxu3 %v1708_v26  ;;  %774 = vmatpush.msrb.mxu0 %v576_v46 }
  0x29   : > { %825 = vmatpush.msrb.mxu1 %v1708_v26  ;;  %500 = vmatmul.f32.gmra.mxu0 %v499_v8  ;;  %v519_v26 = vand.u32 4294901760, %v451_v20  ;;  %v514_v27 = vsub.f32 %v512_v19, %v513_v25 }
  0x2a   : > { %639 = vmatmul.f32.vlgmr.msrb.gmra.mxu2 %v1684_v15  ;;  %585 = vmatmul.f32.gmra.mxu1 %v1676_v13  ;;  %v923_v15 = vld [vmem:[%s2124_s4 + $0x10] sm:$0xff] }
  0x2b   : > { %609 = vmatmul.f32.gmra.mxu3 %v1689_v17  ;;  %827 = vmatpush.msrb.mxu1 %v1720_v31  ;;  %v520_v29 = vsub.f32 %v451_v20, %v519_v26  ;;  %v515_v32 = vand.u32 4294901760, %v514_v27 }
  0x2c   : > { %697 = vmatpush.msrb.mxu3 %v1720_v31  ;;  %937 = vperm.xlu1 %1552, %v923_v15  }
  0x2d   : > { %406 = vperm.xlu2 %1553, %v388_v30   ;;  %v521_v31 = vand.u32 4294901760, %v520_v29 }
  0x2f   : > { %v522_v33 = vsub.f32 %v520_v29, %v521_v31 }
  0x31   : > { %508 = vmatmul.f32.gmra.mxu0 %v507_v24  ;;  %v523_v35 = vand.u32 4294901760, %v522_v33 }
  0x32   : > { %644 = vmatmul.f32.gmra.mxu2 %v1712_v28  ;;  %589 = vmatmul.f32.gmra.mxu1 %v1743_v39 }
  0x33   : > { %701 = vmatmul.f32.vlgmr.msrb.gmra.mxu3 %v481_v21 }
  0x39   : > { %516 = vmatmul.f32.gmra.mxu0 %v515_v32 }
  0x3a   : > { %649 = vmatmul.f32.gmra.mxu2 %v1772_v58  ;;  %593 = vmatmul.f32.gmra.mxu1 %v1780_v2 }
  0x3b   : > { %707 = vmatmul.f32.gmra.mxu3 %v489_v43 }
  0x41   : > { %524 = vmatmul.f32.gmra.mxu0 %v523_v35 }
  0x42   : > { %654 = vmatmul.f32.gmra.mxu2 %v504_v6  ;;  %597 = vmatmul.f32.gmra.mxu1 %v1797_v12 }
  0x43   : > { %713 = vmatmul.f32.gmra.mxu3 %v497_v1 }
  0x49   : > { %776 = vmatmul.f32.vlgmr.msrb.gmra.mxu0 %v1670_v9 }
  0x4a   : > { %659 = vmatmul.f32.gmra.mxu2 %v512_v19  ;;  %601 = vmatmul.f32.gmra.mxu1 %v519_v26 }
  0x4b   : > { %719 = vmatmul.f32.gmra.mxu3 %v505_v11 }
  0x51   : > { %780 = vmatmul.f32.gmra.mxu0 %v1676_v13 }
  0x52   : > { %664 = vmatmul.f32.gmra.mxu2 %v520_v29  ;;  %829 = vmatmul.f32.vlgmr.msrb.gmra.mxu1 %v1670_v9  ;;  %v922_v9 = vld [vmem:[%s2124_s4 + $0x8] sm:$0xff] }
  0x53   : > { %725 = vmatmul.f32.gmra.mxu3 %v513_v25  ;;  %932 = vperm.xlu0 %1551, %v922_v9  }
  0x59   : > { %784 = vmatmul.f32.gmra.mxu0 %v1743_v39 }
  0x5a   : > { %669 = vmatmul.f32.gmra.mxu2 %v1687_v16  ;;  %833 = vmatmul.f32.gmra.mxu1 %v1676_v13  ;;  %v921_v13 = vld [vmem:[%s2124_s4] sm:$0xff]  ;;  %v924_v16 = vld [vmem:[%s2124_s4 + $0x18] sm:$0xff] }
  0x5b   : > { %731 = vmatmul.f32.gmra.mxu3 %v521_v31  ;;  %927 = vperm.xlu2 %1553, %v921_v13  }
  0x61   : > { %788 = vmatmul.f32.gmra.mxu0 %v1780_v2 }
  0x62   : > { %674 = vmatmul.f32.gmra.mxu2 %v1729_v34  ;;  %837 = vmatmul.f32.gmra.mxu1 %v1743_v39 }
  0x63   : > { %737 = vmatmul.f32.gmra.mxu3 %v529_v22  ;;  %942 = vperm.xlu2 %1553, %v924_v16  }
  0x69   : > { %792 = vmatmul.f32.gmra.mxu0 %v1797_v12 }
  0x6a   : > { %841 = vmatmul.f32.gmra.mxu1 %v1780_v2 }
  0x6b   : > { %743 = vmatmul.f32.gmra.mxu3 %v537_v47 }
  0x71   : > { %796 = vmatmul.f32.gmra.mxu0 %v519_v26 }
  0x72   : > { %845 = vmatmul.f32.gmra.mxu1 %v1797_v12 }
  0x79   : > { %800 = vmatmul.f32.gmra.mxu0 %v1672_v10 }
  0x7a   : > { %849 = vmatmul.f32.gmra.mxu1 %v519_v26 }
  0x80   : > { %v1860_v21 = vpop.permute.xlu1 %421 }
  0x81   : > { %804 = vmatmul.f32.gmra.mxu0 %v1689_v17  ;;  %v1863_v22 = vpop.permute.xlu0 %431 }
  0x82   : > { %853 = vmatmul.f32.gmra.mxu1 %v1672_v10  ;;  %v412_v10 = vpop.permute.xlu2 %411 }
  0x88   : > { %v417_v28 = vpop.permute.xlu1 %416 }
  0x89   : > { %v427_v36 = vpop.permute.xlu0 %426 }
  0x8a   : > { %857 = vmatmul.f32.gmra.mxu1 %v1689_v17  ;;  %v407_v51 = vpop.permute.xlu2 %406 }
  0x90   : > { %v397_v37 = vpop.permute.xlu1 %396 }
  0x91   : > { %v402_v43 = vpop.permute.xlu0 %401 }
  0x96   : > { %v485_v34 = vpop.f32.mrf.mxu0 }
  0x97   : > { %v486_v38 = vadd.f32 %v485_v34, %v397_v37  ;;  %v870_v34 = vld [vmem:[%s1888_s16 + $0x2] sm:$0x3] }
  0x98   : > { %vm878_vm1 = vnez %v870_v34 }
  0x9d   : > { %v533_v39 = vpop.f32.mrf.mxu2 }
  0x9e   : > { %v493_v40 = vpop.f32.mrf.mxu0  ;;  %v534_v44 = vadd.f32 %v533_v39, %v427_v36 }
  0x9f   : > { %v582_v41 = vpop.f32.mrf.mxu1  ;;  %v494_v45 = vadd.f32 %v493_v40, %v402_v43  ;;  %v874_v40 = vld [vmem:[%s1888_s16 + $0xa] sm:$0x3] }
  0xa0   : > { %v583_v42 = vadd.f32 %v582_v41, %v486_v38  ;;  %v875_v38 = vld [vmem:[%s1888_s16 + $0xc] sm:$0x3]  ;;  %vm882_vm3 = vnez %v874_v40 }
  0xa1   : > { %vm883_vm2 = vnez %v875_v38 }
  0xa5   : > { %v541_v46 = vpop.f32.mrf.mxu2 }
  0xa6   : > { %v606_v47 = vpop.f32.mrf.mxu3  ;;  %v501_v17 = vpop.f32.mrf.mxu0  ;;  %v542_v36 = vadd.f32 %v541_v46, %v1863_v22 }
  0xa7   : > { %v1865_v48 = vadd.f32 %v606_v47, %v534_v44  ;;  %v586_v49 = vpop.f32.mrf.mxu1  ;;  %v502_v52 = vadd.f32 %v501_v17, %v407_v51 }
  0xa8   : > { %v587_v50 = vadd.f32 %v586_v49, %v494_v45  ;;  %v871_v45 = vld [vmem:[%s1888_s16 + $0x4] sm:$0x3]  ;;  %v1900_v49 = vsel %vm878_vm1, 16843009, %v1586_v3 }
  0xa9   : > { %vm879_vm6 = vnez %v871_v45 }
  0xad   : > { %v640_v53 = vpop.f32.mrf.mxu2 }
  0xae   : > { %v610_v54 = vpop.f32.mrf.mxu3  ;;  %v641_v55 = vadd.f32 %v640_v53, %v583_v42  ;;  %v509_v56 = vpop.f32.mrf.mxu0  ;;  %v891_v53 = vsel %vm883_vm2, 16843009, %v1586_v3 }
  0xaf   : > { %v590_v57 = vpop.f32.mrf.mxu1  ;;  %v510_v59 = vadd.f32 %v509_v56, %v412_v10  ;;  %v873_v10 = vld [vmem:[%s1888_s16 + $0x8] sm:$0x3]  ;;  %v611_v43 = vadd.f32 %v610_v54, %v542_v36 }
  0xb0   : > { %v1867_v58 = vadd.f32 %v590_v57, %v502_v52  ;;  %v872_v52 = vld [vmem:[%s1888_s16 + $0x6] sm:$0x3]  ;;  %vm881_vm5 = vnez %v873_v10 }
  0xb1   : > { %vm880_vm7 = vnez %v872_v52 }
  0xb5   : > { %v645_v6 = vpop.f32.mrf.mxu2 }
  0xb6   : > { %v702_v60 = vpop.f32.mrf.mxu3  ;;  %v517_v62 = vpop.f32.mrf.mxu0  ;;  %v646_v47 = vadd.f32 %v645_v6, %v587_v50 }
  0xb7   : > { %v703_v61 = vadd.f32 %v702_v60, %v641_v55  ;;  %v594_v63 = vpop.f32.mrf.mxu1  ;;  %v518_v1 = vadd.f32 %v517_v62, %v417_v28  ;;  %v890_v60 = vsel %vm882_vm3, 16843009, %v1586_v3 }
  0xb8   : > { %v595_v0 = vadd.f32 %v594_v63, %v510_v59  ;;  %v899_v63 = vunpack.c.0.s8 %v891_v53 }
  0xba   : > { %vm907_vm9 = vcmp.ne.s32.totalorder %v899_v63, 0 }
  0xbd   : > { %v650_v14 = vpop.f32.mrf.mxu2 }
  0xbe   : > { %v525_v2 = vpop.f32.mrf.mxu0  ;;  %v708_v7 = vpop.f32.mrf.mxu3  ;;  %v651_v54 = vadd.f32 %v650_v14, %v1867_v58 }
  0xbf   : > { %v598_v4 = vpop.f32.mrf.mxu1  ;;  %v526_v28 = vadd.f32 %v525_v2, %v1860_v21  ;;  %v1895_v21 = vld [vmem:[%s1888_s16] sm:$0x3]  ;;  %v709_v55 = vadd.f32 %v708_v7, %v646_v47  ;;  %v887_v2 = vsel %vm879_vm6, 16843009, %v1586_v3 }
  0xc0   : > { %v599_v5 = vadd.f32 %v598_v4, %v518_v1  ;;  %vm877_vm4 = vnez %v1895_v21 }
  0xc5   : > { %v655_v24 = vpop.f32.mrf.mxu2 }
  0xc6   : > { %v777_v8 = vpop.f32.mrf.mxu0  ;;  %v1871_v19 = vpop.f32.mrf.mxu3  ;;  %v656_v56 = vadd.f32 %v655_v24, %v595_v0  ;;  %v898_v0 = vunpack.c.0.s8 %v890_v60  ;;  %v918_v60 = vld [vmem:[%s2123_s3 + $0x8] sm:$0xff] }
  0xc7   : > { %v602_v11 = vpop.f32.mrf.mxu1  ;;  %v778_v12 = vadd.f32 %v777_v8, %v703_v61  ;;  %v876_v61 = vld [vmem:[%s1888_s16 + $0xe] sm:$0x3]  ;;  %v715_v6 = vadd.f32 %v1871_v19, %v651_v54 }
  0xc8   : > { %v603_v39 = vadd.f32 %v602_v11, %v526_v28  ;;  %vm884_vm8 = vnez %v876_v61  ;;  %vm906_vm10 = vcmp.ne.s32.totalorder %v898_v0, 0 }
  0xc9   : > { %v892_v19 = vsel %vm884_vm8, 16843009, %v1586_v3 }
  0xca   : > { %v900_v38 = vunpack.c.0.s8 %v892_v19 }
  0xcc   : > { %vm908_vm0 = vcmp.ne.s32.totalorder %v900_v38, 0 }
  0xcd   : > { %v660_v32 = vpop.f32.mrf.mxu2 }
  0xce   : > { %v1869_v18 = vpop.f32.mrf.mxu0  ;;  %v720_v27 = vpop.f32.mrf.mxu3  ;;  %v661_v17 = vadd.f32 %v660_v32, %v599_v5  ;;  %v895_v32 = vunpack.c.0.s8 %v887_v2 }
  0xcf   : > { %v830_v20 = vpop.f32.mrf.mxu1  ;;  %v721_v1 = vadd.f32 %v720_v27, %v656_v56  ;;  %v782_v34 = vadd.f32 %v1869_v18, %v709_v55 }
  0xd0   : > { %v1873_v23 = vadd.f32 %v830_v20, %v778_v12  ;;  %v888_v12 = vsel %vm880_vm7, 16843009, %v1586_v3  ;;  %vm903_vm14 = vcmp.ne.s32.totalorder %v895_v32, 0 }
  0xd2   : > { %v861_v52 = vmax.f32 %v1873_v23, 0.0 }
  0xd5   : > { %v665_v9 = vpop.f32.mrf.mxu2 }
  0xd6   : > { %v1875_v25 = vpop.f32.mrf.mxu0  ;;  %v726_v31 = vpop.f32.mrf.mxu3  ;;  %v666_v44 = vadd.f32 %v665_v9, %v603_v39 }
  0xd7   : > { %v1877_v26 = vpop.f32.mrf.mxu1  ;;  %v727_v50 = vadd.f32 %v726_v31, %v661_v17  ;;  %v786_v24 = vadd.f32 %v1875_v25, %v715_v6 }
  0xd8   : > { %v835_v39 = vadd.f32 %v1877_v26, %v782_v34 }
  0xda   : > { %v862_v26 = vmax.f32 %v835_v39, 0.0 }
  0xdd   : > { %v670_v37 = vpop.f32.mrf.mxu2 }
  0xde   : > { %v789_v29 = vpop.f32.mrf.mxu0  ;;  %v732_v15 = vpop.f32.mrf.mxu3  ;;  %v671_v46 = vadd.f32 %v670_v37, %v1865_v48  ;;  %v889_v48 = vsel %vm881_vm5, 16843009, %v1586_v3  ;;  %v885_v37 = vsel %vm877_vm4, 16843009, %v1586_v3 }
  0xdf   : > { %v1879_v30 = vpop.f32.mrf.mxu1  ;;  %v733_v51 = vadd.f32 %v732_v15, %v666_v44  ;;  %v790_v11 = vadd.f32 %v789_v29, %v721_v1  ;;  %v897_v14 = vunpack.c.0.s8 %v889_v48  ;;  %v893_v44 = vunpack.c.0.s8 %v885_v37 }
  0xe1   : > { %vm905_vm11 = vcmp.ne.s32.totalorder %v897_v14, 0  ;;  %vm901_vm1 = vcmp.ne.s32.totalorder %v893_v44, 0 }
  0xe2   : > { %v909_v48 = vsel %vm901_vm1, %v861_v52, 0.0 }
  0xe3   : > { %v1979_v0 = vand.u32 4294901760, %v909_v48 }
  0xe5   : > { %v675_v4 = vpop.f32.mrf.mxu2 }
  0xe6   : > { %v793_v33 = vpop.f32.mrf.mxu0  ;;  %v738_v41 = vpop.f32.mrf.mxu3  ;;  %v676_v27 = vadd.f32 %v675_v4, %v611_v43  ;;  %v950_v4 = vsel %vm945_vm12, %v918_v60, 0 }
  0xe7   : > { %v1881_v35 = vpop.f32.mrf.mxu1  ;;  %v739_v57 = vadd.f32 %v738_v41, %v671_v46  ;;  %v794_v62 = vadd.f32 %v793_v33, %v727_v50 }
  0xe8   : > { %v843_v33 = vadd.f32 %v1881_v35, %v790_v11  ;;  %v894_v35 = vunpack.c.0.s8 %v1900_v49 }
  0xea   : > { %v864_v40 = vmax.f32 %v843_v33, 0.0  ;;  %vm1929_vm15 = vcmp.ne.s32.totalorder %v894_v35, 0 }
  0xeb   : > { %v910_v23 = vsel %vm1929_vm15, %v862_v26, 0.0 }
  0xee   : > { %v797_v13 = vpop.f32.mrf.mxu0  ;;  %v744_v31 = vpop.f32.mrf.mxu3 }
  0xef   : > { %v846_v16 = vpop.f32.mrf.mxu1  ;;  %v798_v59 = vadd.f32 %v797_v13, %v733_v51  ;;  %v839_v13 = vadd.f32 %v1879_v30, %v786_v24  ;;  %v745_v36 = vadd.f32 %v744_v31, %v676_v27  ;;  %v917_v30 = vld [vmem:[%s2123_s3] sm:$0xff]  ;;  %v1989_v24 = vand.u32 4294901760, %v950_v4 }
  0xf0   : > { %v847_v7 = vadd.f32 %v846_v16, %v794_v62  ;;  %v896_v16 = vunpack.c.0.s8 %v888_v12  ;;  %v947_v47 = vsel %vm945_vm12, %v917_v30, 0 }
  0xf1   : > { %v863_v10 = vmax.f32 %v839_v13, 0.0  ;;  %v1941_v55 = vand.u32 4294901760, %v947_v47 }
  0xf2   : > { %v865_v29 = vmax.f32 %v847_v7, 0.0  ;;  %vm904_vm13 = vcmp.ne.s32.totalorder %v896_v16, 0 }
  0xf3   : > { %v911_v53 = vsel %vm903_vm14, %v863_v10, 0.0  ;;  %v1967_v2 = vsub.f32 %v947_v47, %v1941_v55 }
  0xf4   : > { %v1955_v61 = vand.u32 4294901760, %v911_v53 }
  0xf6   : > { %v801_v22 = vpop.f32.mrf.mxu0 }
  0xf7   : > { %v850_v42 = vpop.f32.mrf.mxu1  ;;  %v802_v5 = vadd.f32 %v801_v22, %v739_v57  ;;  %v912_v22 = vsel %vm904_vm13, %v864_v40, 0.0 }
  0xf8   : > { %v851_v58 = vadd.f32 %v850_v42, %v798_v59  ;;  %v913_v42 = vsel %vm905_vm11, %v865_v29, 0.0  ;;  %v1943_v56 = vand.u32 4294901760, %v912_v22 }
  0xf9   : > { %v1935_v46 = vand.u32 4294901760, %v913_v42 }
  0xfa   : > { %v866_v9 = vmax.f32 %v851_v58, 0.0  ;;  %v1973_v58 = vsub.f32 %v912_v22, %v1943_v56 }
  0xfb   : > { %v1958_v62 = vsub.f32 %v913_v42, %v1935_v46  ;;  %v920_v42 = vld [vmem:[%s2123_s3 + $0x18] sm:$0xff] }
  0xfc   : > { %v914_v41 = vsel %vm906_vm10, %v866_v9, 0.0  ;;  %v1049_v33 = vand.u32 4294901760, %v1973_v58  ;;  %v919_v9 = vld [vmem:[%s2123_s3 + $0x10] sm:$0xff]  ;;  %v956_v17 = vsel %vm945_vm12, %v920_v42, 0 }
  0xfd   : > { %v1933_v49 = vand.u32 4294901760, %v914_v41  ;;  %v1043_v11 = vand.u32 4294901760, %v1958_v62  ;;  %v953_v34 = vsel %vm945_vm12, %v919_v9, 0 }
  0xfe   : > { %v805_v28 = vpop.f32.mrf.mxu0 }
  0xff   : > { %v854_v8 = vpop.f32.mrf.mxu1  ;;  %v806_v18 = vadd.f32 %v805_v28, %v745_v36  ;;  %v1946_v57 = vsub.f32 %v914_v41, %v1933_v49  ;;  %v1044_v16 = vsub.f32 %v1958_v62, %v1043_v11  ;;  %v2012_v28 = vsub.f32 %v950_v4, %v1989_v24 }
 0x100   : > { %v855_v20 = vadd.f32 %v854_v8, %v802_v5  ;;  %v1970_v5 = vand.u32 4294901760, %v910_v23  ;;  %v1982_v8 = vsub.f32 %v911_v53, %v1955_v61  ;;  %v998_v41 = vand.u32 4294901760, %v953_v34 }
 0x101   : > { %v1037_v7 = vand.u32 4294901760, %v1946_v57  ;;  %v1045_v30 = vand.u32 4294901760, %v1044_v16  ;;  %v992_v40 = vand.u32 4294901760, %v2012_v28  ;;  %v1006_v53 = vand.u32 4294901760, %v956_v17 }
 0x102   : > { %v867_v15 = vmax.f32 %v855_v20, 0.0  ;;  %v984_v20 = vand.u32 4294901760, %v1967_v2  ;;  %v1993_v32 = vsub.f32 %v910_v23, %v1970_v5  ;;  %v1055_v19 = vand.u32 4294901760, %v1982_v8 }
 0x103   : > { %v1038_v31 = vsub.f32 %v1946_v57, %v1037_v7  ;;  %v999_v47 = vsub.f32 %v953_v34, %v998_v41 }
 0x104   : > { %v915_v25 = vsel %vm907_vm9, %v867_v15, 0.0  ;;  %v2002_v15 = vsub.f32 %v909_v48, %v1979_v0  ;;  %v985_v29 = vsub.f32 %v1967_v2, %v984_v20  ;;  %v1061_v37 = vand.u32 4294901760, %v1993_v32 }
 0x105   : > { %v1926_v43 = vand.u32 4294901760, %v915_v25  ;;  %v1039_v36 = vand.u32 4294901760, %v1038_v31  ;;  %v1056_v35 = vsub.f32 %v1982_v8, %v1055_v19  ;;  %v1000_v52 = vand.u32 4294901760, %v999_v47 }
 0x106   : > { %v1067_v38 = vand.u32 4294901760, %v2002_v15  ;;  %v986_v39 = vand.u32 4294901760, %v985_v29  ;;  %v1062_v10 = vsub.f32 %v1993_v32, %v1061_v37  ;;  %vm1316_vm9 = vcmask 64512  }
 0x107   : > { %v858_v21 = vpop.f32.mrf.mxu1  ;;  %v1939_v54 = vsub.f32 %v915_v25, %v1926_v43  ;;  %v1050_v25 = vsub.f32 %v1973_v58, %v1049_v33 }
 0x108   : > { %v859_v45 = vadd.f32 %v858_v21, %v806_v18  ;;  %v1057_v21 = vand.u32 4294901760, %v1056_v35  ;;  %v1068_v44 = vsub.f32 %v2002_v15, %v1067_v38  ;;  %v1063_v26 = vand.u32 4294901760, %v1062_v10 }
 0x109   : > { %v1031_v1 = vand.u32 4294901760, %v1939_v54  ;;  %v1051_v18 = vand.u32 4294901760, %v1050_v25 }
 0x10a   : > { %v868_v51 = vmax.f32 %v859_v45, 0.0  ;;  %v993_v45 = vsub.f32 %v2012_v28, %v992_v40  ;;  %v1069_v22 = vand.u32 4294901760, %v1068_v44 }
 0x10b   : > { %v1032_v14 = vsub.f32 %v1939_v54, %v1031_v1 }
 0x10c   : > { %v916_v50 = vsel %vm908_vm0, %v868_v51, 0.0  ;;  %v994_v51 = vand.u32 4294901760, %v993_v45 }
 0x10d   : > { %v1948_v59 = vand.u32 4294901760, %v916_v50  ;;  %v1033_v13 = vand.u32 4294901760, %v1032_v14 }
 0x10f   : > { %v1961_v63 = vsub.f32 %v916_v50, %v1948_v59  ;;  %967 = vmatpush.msra.mxu2 %v1948_v59  ;;  %1256 = vmatpush.msra.mxu1 %v1948_v59  ;;  %v1001_v50 = vsub.f32 %v999_v47, %v1000_v52 }
 0x111   : > { %969 = vmatpush.msra.mxu2 %v1926_v43  ;;  %1258 = vmatpush.msra.mxu1 %v1926_v43  ;;  %v1025_v6 = vand.u32 4294901760, %v1961_v63 }
 0x113   : > { %971 = vmatpush.msra.mxu2 %v1933_v49  ;;  %1201 = vmatpush.msra.mxu0 %v1025_v6  ;;  %v1026_v12 = vsub.f32 %v1961_v63, %v1025_v6 }
 0x114   : > { %1260 = vmatpush.msra.mxu1 %v1933_v49 }
 0x115   : > { %973 = vmatpush.msra.mxu2 %v1935_v46  ;;  %1205 = vmatpush.msra.mxu0 %v1031_v1  ;;  %v1027_v27 = vand.u32 4294901760, %v1026_v12  ;;  %v1289_v12 = vld [vmem:[%s363_s11 + $0x2] sm:$0x3] }
 0x116   : > { %1262 = vmatpush.msra.mxu1 %v1935_v46  ;;  %vm1293_vm2 = vnez %v1289_v12 }
 0x117   : > { %975 = vmatpush.msra.mxu2 %v1943_v56  ;;  %1028 = vmatpush.msra.mxu3 %v1027_v27  ;;  %v1290_v27 = vld [vmem:[%s363_s11 + $0x4] sm:$0x3]  ;;  %v1297_v29 = vsel %vm1293_vm2, 16843009, %v1586_v3 }
 0x118   : > { %1209 = vmatpush.msra.mxu0 %v1037_v7  ;;  %1264 = vmatpush.msra.mxu1 %v1943_v56  ;;  %v928_v7 = vpop.permute.xlu2 %927  ;;  %vm1294_vm4 = vnez %v1290_v27 }
 0x119   : > { %977 = vmatpush.msra.mxu2 %v1955_v61  ;;  %1034 = vmatpush.msra.mxu3 %v1033_v13  ;;  %v1298_v25 = vsel %vm1294_vm4, 16843009, %v1586_v3 }
 0x11a   : > { %1213 = vmatpush.msra.mxu0 %v1043_v11  ;;  %1266 = vmatpush.msra.mxu1 %v1955_v61  ;;  %v1302_v10 = vunpack.c.0.s8 %v1298_v25 }
 0x11b   : > { %979 = vmatpush.msra.mxu2 %v1970_v5  ;;  %1040 = vmatpush.msra.mxu3 %v1039_v36 }
 0x11c   : > { %1217 = vmatpush.msra.mxu0 %v1049_v33  ;;  %1268 = vmatpush.msra.mxu1 %v1970_v5  ;;  %vm2079_vm8 = vcmp.ne.s32.totalorder %v1302_v10, 0 }
 0x11d   : > { %981 = vmatpush.msra.mxu2 %v1979_v0  ;;  %1046 = vmatpush.msra.mxu3 %v1045_v30 }
 0x11e   : > { %1221 = vmatpush.msra.mxu0 %v1055_v19  ;;  %1270 = vmatpush.msra.mxu1 %v1979_v0 }
 0x11f   : > { %987 = vmatmul.f32.vlgmr.msra.gmra.mxu2 %v986_v39  ;;  %1052 = vmatpush.msra.mxu3 %v1051_v18  ;;  %v1291_v39 = vld [vmem:[%s363_s11 + $0x6] sm:$0x3] }
 0x120   : > { %1098 = vmatpush.msrb.mxu2 %v1961_v63  ;;  %1225 = vmatpush.msra.mxu0 %v1061_v37  ;;  %v1301_v37 = vunpack.c.0.s8 %v1297_v29  ;;  %v943_v42 = vpop.permute.xlu2 %942  ;;  %vm1295_vm6 = vnez %v1291_v39 }
 0x121   : > { %1058 = vmatpush.msra.mxu3 %v1057_v21  ;;  %1272 = vmatmul.f32.vlgmr.msra.gmra.mxu1 %v1941_v55 }
 0x122   : > { %1101 = vmatpush.msrb.mxu2 %v1939_v54  ;;  %1229 = vmatpush.msra.mxu0 %v1067_v38  ;;  %v1007_v54 = vsub.f32 %v956_v17, %v1006_v53  ;;  %vm2071_vm5 = vcmp.ne.s32.totalorder %v1301_v37, 0 }
 0x123   : > { %1064 = vmatpush.msra.mxu3 %v1063_v26  ;;  %1231 = vmatmul.f32.vlgmr.msra.gmra.mxu0 %v1941_v55 }
 0x124   : > { %1104 = vmatpush.msrb.mxu2 %v1946_v57  ;;  %v1002_v57 = vand.u32 4294901760, %v1001_v50  ;;  %v1008_v60 = vand.u32 4294901760, %v1007_v54 }
 0x125   : > { %1070 = vmatpush.msra.mxu3 %v1069_v22 }
 0x126   : > { %1107 = vmatpush.msrb.mxu2 %v1958_v62  ;;  %1072 = vmatmul.f32.vlgmr.msra.gmra.mxu3 %v1941_v55 }
 0x127   : > { %995 = vmatmul.f32.gmra.mxu2 %v994_v51  ;;  %1150 = vmatpush.msrb.mxu3 %v1948_v59 }
 0x128   : > { %1110 = vmatpush.msrb.mxu2 %v1973_v58  ;;  %v933_v58 = vpop.permute.xlu0 %932 }
 0x129   : > { %1152 = vmatpush.msrb.mxu3 %v1926_v43  ;;  %1276 = vmatmul.f32.gmra.mxu1 %v1989_v24  ;;  %v1009_v43 = vsub.f32 %v1007_v54, %v1008_v60 }
 0x12a   : > { %1113 = vmatpush.msrb.mxu2 %v1982_v8 }
 0x12b   : > { %1154 = vmatpush.msrb.mxu3 %v1933_v49  ;;  %1235 = vmatmul.f32.gmra.mxu0 %v1989_v24  ;;  %v1010_v49 = vand.u32 4294901760, %v1009_v43 }
 0x12c   : > { %1116 = vmatpush.msrb.mxu2 %v1993_v32  ;;  %v1288_v32 = vld [vmem:[%s363_s11] sm:$0x3] }
 0x12d   : > { %1156 = vmatpush.msrb.mxu3 %v1935_v46  ;;  %vm1292_vm3 = vnez %v1288_v32 }
 0x12e   : > { %1119 = vmatpush.msrb.mxu2 %v2002_v15  ;;  %1076 = vmatmul.f32.gmra.mxu3 %v1989_v24  ;;  %v938_v15 = vpop.permute.xlu1 %937  ;;  %v1296_v34 = vsel %vm1292_vm3, 16843009, %v1586_v3 }
 0x12f   : > { %1003 = vmatmul.f32.gmra.mxu2 %v1002_v57  ;;  %1158 = vmatpush.msrb.mxu3 %v1943_v56  ;;  %v1299_v57 = vsel %vm1295_vm6, 16843009, %v1586_v3 }
 0x131   : > { %1160 = vmatpush.msrb.mxu3 %v1955_v61  ;;  %1280 = vmatmul.f32.gmra.mxu1 %v998_v41 }
 0x133   : > { %1162 = vmatpush.msrb.mxu3 %v1970_v5  ;;  %1239 = vmatmul.f32.gmra.mxu0 %v998_v41 }
 0x135   : > { %1164 = vmatpush.msrb.mxu3 %v1979_v0 }
 0x136   : > { %1080 = vmatmul.f32.gmra.mxu3 %v998_v41 }
 0x137   : > { %1011 = vmatmul.f32.gmra.mxu2 %v1010_v49 }
 0x139   : > { %1284 = vmatmul.f32.gmra.mxu1 %v1006_v53 }
 0x13b   : > { %1243 = vmatmul.f32.gmra.mxu0 %v1006_v53 }
 0x13e   : > { %1084 = vmatmul.f32.gmra.mxu3 %v1006_v53 }
 0x13f   : > { %1122 = vmatmul.f32.vlgmr.msrb.gmra.mxu2 %v1967_v2 }
 0x146   : > { %1168 = vmatmul.f32.vlgmr.msrb.gmra.mxu3 %v984_v20 }
 0x147   : > { %1127 = vmatmul.f32.gmra.mxu2 %v2012_v28 }
 0x14e   : > { %1174 = vmatmul.f32.gmra.mxu3 %v992_v40  ;;  %v1300_v40 = vunpack.c.0.s8 %v1296_v34 }
 0x14f   : > { %1132 = vmatmul.f32.gmra.mxu2 %v999_v47 }
 0x150   : > { %vm2075_vm7 = vcmp.ne.s32.totalorder %v1300_v40, 0 }
 0x156   : > { %1180 = vmatmul.f32.gmra.mxu3 %v1000_v52 }
 0x157   : > { %1137 = vmatmul.f32.gmra.mxu2 %v1007_v54 }
 0x15e   : > { %1186 = vmatmul.f32.gmra.mxu3 %v1008_v60  ;;  %v1587_v60 = vmov 32.0  }
 0x15f   : > { %1554 = vrcp.f32 %v1587_v60 }
 0x19e   : > { %v1273_v2 = vpop.f32.mrf.mxu1 }
 0x1a0   : > { %v1232_v1 = vpop.f32.mrf.mxu0 }
 0x1a2   : > { %v988_v46 = vpop.f32.mrf.mxu2 }
 0x1a3   : > { %v989_v8 = vadd.f32 %v988_v46, %v928_v7 }
 0x1a6   : > { %v1277_v14 = vpop.f32.mrf.mxu1 }
 0x1a8   : > { %v1236_v0 = vpop.f32.mrf.mxu0 }
 0x1a9   : > { %v1073_v55 = vpop.f32.mrf.mxu3 }
 0x1aa   : > { %v996_v56 = vpop.f32.mrf.mxu2  ;;  %v1074_v20 = vadd.f32 %v1073_v55, %v989_v8  ;;  %v1558_v55 = vld [vmem:[%s1696_s22 + $0x8] sm:$0xff] }
 0x1ab   : > { %v997_v6 = vadd.f32 %v996_v56, %v933_v58 }
 0x1ae   : > { %v1281_v18 = vpop.f32.mrf.mxu1 }
 0x1b0   : > { %v1240_v35 = vpop.f32.mrf.mxu0 }
 0x1b1   : > { %v1077_v59 = vpop.f32.mrf.mxu3 }
 0x1b2   : > { %v1004_v23 = vpop.f32.mrf.mxu2  ;;  %v1078_v11 = vadd.f32 %v1077_v59, %v997_v6 }
 0x1b3   : > { %v1005_v13 = vadd.f32 %v1004_v23, %v938_v15 }
 0x1b8   : > { %v1244_v23 = vpop.f32.mrf.mxu0 }
 0x1b9   : > { %v1081_v61 = vpop.f32.mrf.mxu3 }
 0x1ba   : > { %v1012_v62 = vpop.f32.mrf.mxu2  ;;  %v1082_v28 = vadd.f32 %v1081_v61, %v1005_v13  ;;  %v1303_v61 = vunpack.c.0.s8 %v1299_v57 }
 0x1bb   : > { %v1013_v45 = vadd.f32 %v1012_v62, %v943_v42 }
 0x1bc   : > { %vm1307_vm10 = vcmp.ne.s32.totalorder %v1303_v61, 0 }
 0x1c1   : > { %v1085_v48 = vpop.f32.mrf.mxu3 }
 0x1c2   : > { %v1123_v63 = vpop.f32.mrf.mxu2  ;;  %v1086_v22 = vadd.f32 %v1085_v48, %v1013_v45  ;;  %v1559_v48 = vld [vmem:[%s1696_s22] sm:$0xff] }
 0x1c3   : > { %v1124_v33 = vadd.f32 %v1123_v63, %v1074_v20 }
 0x1c9   : > { %v1169_v4 = vpop.f32.mrf.mxu3 }
 0x1ca   : > { %v1128_v5 = vpop.f32.mrf.mxu2  ;;  %v1170_v16 = vadd.f32 %v1169_v4, %v1124_v33  ;;  %v1555_v4 = vpop.eup %1554 }
 0x1cb   : > { %v1129_v24 = vadd.f32 %v1128_v5, %v1078_v11  ;;  %v1331_v8 = vmul.f32 32.0, %v1555_v4  ;;  %vm1335_vm11 = vweird.f32 %v1555_v4 }
 0x1cc   : > { %v1233_v38 = vadd.f32 %v1232_v1, %v1170_v16  ;;  %v1560_v1 = vld [vmem:[%s1696_s22 + $0x10] sm:$0xff] }
 0x1cd   : > { %v1332_v27 = vsub.f32 1.0, %v1331_v8 }
 0x1ce   : > { %v1274_v17 = vadd.f32 %v1273_v2, %v1233_v38  ;;  %v1285_v2 = vpop.f32.mrf.mxu1 }
 0x1d0   : > { %v1308_v43 = vsel %vm2075_vm7, %v1274_v17, 0.0 }
 0x1d1   : > { %v1175_v31 = vpop.f32.mrf.mxu3  ;;  %v1312_v63 = vadd.f32 %v1559_v48, %v1308_v43 }
 0x1d2   : > { %v1176_v9 = vadd.f32 %v1175_v31, %v1129_v24  ;;  %v1133_v19 = vpop.f32.mrf.mxu2 }
 0x1d3   : > { %v1134_v30 = vadd.f32 %v1133_v19, %v1082_v28  ;;  %v1317_v7 = vsel %vm1316_vm9, %v1312_v63, 0.0 }
 0x1d4   : > { %v1237_v36 = vadd.f32 %v1236_v0, %v1176_v9  ;;  %v1333_v9 = vmul.f32 %v1555_v4, %v1332_v27 }
 0x1d6   : > { %v1278_v21 = vadd.f32 %v1277_v14, %v1237_v36  ;;  %v1561_v14 = vld [vmem:[%s1696_s22 + $0x18] sm:$0xff]  ;;  %v1334_v13 = vadd.f32 %v1555_v4, %v1333_v9 }
 0x1d8   : > { %v1309_v50 = vsel %vm2071_vm5, %v1278_v21, 0.0  ;;  %v1336_v28 = vsel %vm1335_vm11, %v1555_v4, %v1334_v13 }
 0x1d9   : > { %v1181_v41 = vpop.f32.mrf.mxu3  ;;  %v1313_v56 = vadd.f32 %v1558_v55, %v1309_v50 }
 0x1da   : > { %v1182_v44 = vadd.f32 %v1181_v41, %v1134_v30  ;;  %v1138_v52 = vpop.f32.mrf.mxu2 }
 0x1db   : > { %v1139_v49 = vadd.f32 %v1138_v52, %v1086_v22  ;;  %v1318_v58 = vsel %vm1316_vm9, %v1313_v56, 0.0 }
 0x1dc   : > { %v1241_v26 = vadd.f32 %v1240_v35, %v1182_v44  ;;  %v1319_v11 = vadd.f32 %v1318_v58, %v1317_v7 }
 0x1de   : > { %v1282_v54 = vadd.f32 %v1281_v18, %v1241_v26 }
 0x1e0   : > { %v1310_v46 = vsel %vm2079_vm8, %v1282_v54, 0.0 }
 0x1e1   : > { %v1187_v59 = vpop.f32.mrf.mxu3  ;;  %v1314_v3 = vadd.f32 %v1560_v1, %v1310_v46 }
 0x1e2   : > { %v1188_v62 = vadd.f32 %v1187_v59, %v1139_v49 }
 0x1e3   : > { %v1320_v0 = vsel %vm1316_vm9, %v1314_v3, 0.0 }
 0x1e4   : > { %v1245_v5 = vadd.f32 %v1244_v23, %v1188_v62  ;;  %v1321_v24 = vadd.f32 %v1320_v0, %v1319_v11 }
 0x1e6   : > { %v1286_v6 = vadd.f32 %v1285_v2, %v1245_v5 }
 0x1e8   : > { %v1311_v12 = vsel %vm1307_vm10, %v1286_v6, 0.0 }
 0x1e9   : > { %v1315_v20 = vadd.f32 %v1561_v14, %v1311_v12 }
 0x1eb   : > { %v1322_v32 = vsel %vm1316_vm9, %v1315_v20, 0.0 }
 0x1ec   : > { %v1323_v31 = vadd.f32 %v1322_v32, %v1321_v24 }
 0x1ee   : > { %v1324_v33 = vrot.slane %v1323_v31, 4 }
 0x1f0   : > { %v1325_v15 = vadd.f32 %v1324_v33, %v1323_v31 }
 0x1f2   : > { %v1326_v19 = vrot.slane %v1325_v15, 2 }
 0x1f4   : > { %v1327_v16 = vadd.f32 %v1326_v19, %v1325_v15 }
 0x1f6   : > { %v1328_v29 = vrot.slane %v1327_v16, 1 }
 0x1f8   : > { %v1329_v34 = vadd.f32 %v1328_v29, %v1327_v16 }
 0x1fa   : > { %v1337_v36 = vmul.f32 %v1336_v28, %v1329_v34 }
 0x1fc   : > { %v1338_v25 = vsub.f32 %v1312_v63, %v1337_v36  ;;  %v1339_v37 = vsub.f32 %v1313_v56, %v1337_v36  ;;  %v1340_v35 = vsub.f32 %v1314_v3, %v1337_v36  ;;  %v1341_v38 = vsub.f32 %v1315_v20, %v1337_v36 }
 0x1fe   : > { %v1342_v30 = vmul.f32 %v1338_v25, %v1338_v25  ;;  %v1343_v39 = vmul.f32 %v1339_v37, %v1339_v37  ;;  %v1344_v40 = vmul.f32 %v1340_v35, %v1340_v35  ;;  %v1345_v41 = vmul.f32 %v1341_v38, %v1341_v38 }
 0x200   : > { %v1346_v18 = vsel %vm1316_vm9, %v1342_v30, 0.0  ;;  %v1347_v10 = vsel %vm1316_vm9, %v1343_v39, 0.0  ;;  %v1349_v21 = vsel %vm1316_vm9, %v1344_v40, 0.0  ;;  %v1351_v45 = vsel %vm1316_vm9, %v1345_v41, 0.0 }
 0x201   : > { %v1348_v42 = vadd.f32 %v1347_v10, %v1346_v18 }
 0x203   : > { %v1350_v44 = vadd.f32 %v1349_v21, %v1348_v42 }
 0x205   : > { %v1352_v47 = vadd.f32 %v1351_v45, %v1350_v44 }
 0x207   : > { %v1353_v17 = vrot.slane %v1352_v47, 4 }
 0x209   : > { %v1354_v26 = vadd.f32 %v1353_v17, %v1352_v47 }
 0x20b   : > { %v1355_v22 = vrot.slane %v1354_v26, 2 }
 0x20d   : > { %v1356_v51 = vadd.f32 %v1355_v22, %v1354_v26 }
 0x20f   : > { %v1357_v52 = vrot.slane %v1356_v51, 1 }
 0x211   : > { %v1358_v53 = vadd.f32 %v1357_v52, %v1356_v51 }
 0x213   : > { %v1359_v50 = vmul.f32 %v1358_v53, %v1336_v28 }
 0x215   : > { %v1360_v54 = vadd.f32 1e-05, %v1359_v50 }
 0x217   : > { %1556 = vrsqrt.f32 %v1360_v54  ;;  %vm1367_vm13 = vweird.f32 %v1360_v54 }
 0x21d   : > { %v1557_v57 = vpop.eup %1556 }
 0x21e   : > { %v1362_v60 = vmul.f32 %v1557_v57, %v1360_v54  ;;  %vm1368_vm12 = vweird.f32 %v1557_v57 }
 0x21f   : > { %vm1369_vm14 = vmor %vm1367_vm13, %vm1368_vm12 }
 0x220   : > { %v1363_v43 = vmul.f32 %v1557_v57, %v1362_v60 }
 0x222   : > { %v1364_v49 = vmul.f32 0.5, %v1363_v43 }
 0x224   : > { %v1365_v46 = vsub.f32 1.5, %v1364_v49 }
 0x226   : > { %v1366_v55 = vmul.f32 %v1557_v57, %v1365_v46 }
 0x228   : > { %v1370_v56 = vsel %vm1369_vm14, %v1557_v57, %v1366_v55 }
 0x229   : > { %v1371_v59 = vmul.f32 %v1370_v56, %v1338_v25  ;;  %v1372_v23 = vmul.f32 %v1370_v56, %v1339_v37  ;;  %v1373_v61 = vmul.f32 %v1370_v56, %v1340_v35  ;;  %v1374_v62 = vmul.f32 %v1370_v56, %v1341_v38 }
 0x22b   : > { %1375 = vst.msk [vmem:[%s371_s13] sm:$0xff] %vm1316_vm9, %v1371_v59 }
 0x22c   : > { %1376 = vst.msk [vmem:[%s371_s13 + $0x8] sm:$0xff] %vm1316_vm9, %v1372_v23 }
 0x22d   : > { %1377 = vst.msk [vmem:[%s371_s13 + $0x10] sm:$0xff] %vm1316_vm9, %v1373_v61 }
 0x22e   : > { %1378 = vst.msk [vmem:[%s371_s13 + $0x18] sm:$0xff] %vm1316_vm9, %v1374_v62 }
 0x22f PF: > { %s17_s26 = sadd.s32 1, %s1584_s26   ;;  %s2136_s24 = smov %s1580_s25 }
 0x230   : > { %p14_p5 = scmp.ge.s32.totalorder %s17_s26, 4   ;;  %s2137_s25 = smov %s2139_s27 }
 0x232   :  { %16 = sbr.rel (!%p14_p5) target bundleno = 2 (0x2), region = 84 }

</bundles_post_ra>
